<compile_context>
chip_gen: v6e
topology: v6e:2x2x1
jax: 0.10.0
libtpu: 0.0.40
codegen_flags: <defaults>
</compile_context>

<pallas_src>
import functools

import jax
import jax.numpy as jnp
from jax.experimental import pallas as pl
from jax.experimental.pallas import tpu as pltpu

LANES = 128
_SUBLANES = 8
_ALIGN = LANES * _SUBLANES  # 1024 elements: minimal kernel-friendly size
_MiB = 1 << 20

# generation -> (pipeline-buffer byte budget, vmem_limit_bytes for CompilerParams)
_VMEM_CFG = {
    7: (32 * _MiB, 48 * _MiB),   # v7x: 64 MiB physical VMEM per TensorCore
    6: (16 * _MiB, 40 * _MiB),   # v6e: 32 MiB default scoped / 128 MiB physical
    5: (8 * _MiB, 32 * _MiB),    # v5e: 16 MiB default scoped / 128 MiB physical
    0: (8 * _MiB, 32 * _MiB),    # unknown: conservative (safe on every gen)
}


def _tpu_generation():
    """Best-effort TPU generation from device_kind; 0 = unknown/conservative."""
    try:
        kind = jax.devices()[0].device_kind
    except Exception:
        return 0
    k = kind.lower().replace(" ", "").replace("-", "")
    for g in (7, 6, 5, 4):
        if f"v{g}" in k or f"tpu{g}" in k:
            return g
    return 0


def _wmse_kernel(in_ref, tgt_ref, w_ref, out_ref, *, compute_dtype):
    x = in_ref[...].astype(compute_dtype)
    t = tgt_ref[...].astype(compute_dtype)
    w = w_ref[...].astype(compute_dtype)
    d = x - t
    out_ref[...] = (d * d * w).astype(out_ref.dtype)


def _run_wmse(x2, t2, w2, out_dtype, block_shape, index_map, grid, *,
              compute_dtype, vmem_limit_bytes):
    """Launch the elementwise kernel over a 2-D view with the given blocking."""
    spec = pl.BlockSpec(block_shape, index_map)
    n = x2.size
    bytes_accessed = sum(int(a.size) * a.dtype.itemsize for a in (x2, t2, w2))
    bytes_accessed += n * jnp.dtype(out_dtype).itemsize
    cost = pl.CostEstimate(flops=3 * n, transcendentals=0,
                           bytes_accessed=bytes_accessed)
    return pl.pallas_call(
        functools.partial(_wmse_kernel, compute_dtype=compute_dtype),
        out_shape=jax.ShapeDtypeStruct(x2.shape, out_dtype),
        grid_spec=pltpu.PrefetchScalarGridSpec(
            num_scalar_prefetch=0,
            grid=grid,
            in_specs=[spec, spec, spec],
            out_specs=spec,
        ),
        compiler_params=pltpu.CompilerParams(
            dimension_semantics=("parallel",),
            vmem_limit_bytes=vmem_limit_bytes,
        ),
        cost_estimate=cost,
    )(x2, t2, w2)


def weighted_mse_loss(inp, target, weight, *, tile_rows=None,
                      min_kernel_elems=1 << 20):
    """Elementwise (input - target)**2 * weight; same shape as input."""
    assert inp.shape == target.shape == weight.shape
    orig_shape = inp.shape
    n = inp.size
    out_dtype = jnp.result_type(inp.dtype, target.dtype, weight.dtype)

    gen = _tpu_generation()
    # Native bf16 compute on v6e/v7x (bf16 VPU); f32 upcast elsewhere (v5e has
    # no bf16 VALU) and for every other dtype.
    compute_dtype = (jnp.bfloat16
                     if (out_dtype == jnp.bfloat16 and gen >= 6)
                     else jnp.float32)

    def _fallback():
        cd = compute_dtype
        r = (inp.astype(cd) - target.astype(cd)) ** 2 * weight.astype(cd)
        return r.astype(out_dtype)

    # Tiny inputs: pallas_call + pipeline overhead dominates -> plain XLA fusion
    # (already the ideal 3-read/1-write single pass).
    if n < max(min_kernel_elems, _ALIGN):
        return _fallback()

    budget, vmem_limit = _VMEM_CFG.get(gen, _VMEM_CFG[0])
    itemsize = max(jnp.dtype(a.dtype).itemsize for a in (inp, target, weight))
    # Sublane packing multiple: 8 rows (f32), 16 (bf16/fp16), 32 (int8/fp8).
    pack = _SUBLANES * max(1, 4 // itemsize)

    fx = inp.reshape(-1)
    ft = target.reshape(-1)
    fw = weight.reshape(-1)

    rows = n // LANES
    if n % LANES == 0 and rows >= pack:
        # Lane-dense (rows, 128) slab; grid over row tiles, ragged last block
        # masked by Pallas.  4 arrays x 2 buffers x (tr*128*itemsize) <= budget.
        tr = tile_rows if tile_rows is not None else (budget // 8) // (LANES * itemsize)
        tr = max(pack, (tr // pack) * pack)
        tr = min(tr, (rows // pack) * pack)      # never exceed the array extent
        grid = (pl.cdiv(rows, tr),)
        out2 = _run_wmse(
            fx.reshape(rows, LANES), ft.reshape(rows, LANES),
            fw.reshape(rows, LANES), out_dtype,
            (tr, LANES), lambda i: (i, 0), grid,
            compute_dtype=compute_dtype, vmem_limit_bytes=vmem_limit)
        return out2.reshape(orig_shape)

    # Flat size not a multiple of 128 (or too few rows): single pass over a
    # (1, n) view with 128-wide lane blocks and a masked ragged last block.
    # No prefix slices, no tail recompute, no concatenate -> ideal 4N traffic.
    # (Budget accounts for the 8x sublane padding a one-row VMEM block pays.)
    blk = (budget // (8 * 8 * itemsize)) // LANES * LANES
    blk = max(LANES, min(blk, (n // LANES) * LANES))
    grid = (pl.cdiv(n, blk),)
    out2 = _run_wmse(
        fx.reshape(1, n), ft.reshape(1, n), fw.reshape(1, n), out_dtype,
        (1, blk), lambda i: (0, i), grid,
        compute_dtype=compute_dtype, vmem_limit_bytes=vmem_limit)
    return out2.reshape(orig_shape)


if __name__ == "__main__":
    key = jax.random.PRNGKey(0)

    def make(shape, k, dtype=jnp.float32):
        k1, k2, k3 = jax.random.split(k, 3)
        x = jax.random.normal(k1, shape, dtype=jnp.float32).astype(dtype)
        t = jax.random.normal(k2, shape, dtype=jnp.float32).astype(dtype)
        w = jax.random.uniform(k3, shape, dtype=jnp.float32).astype(dtype)
        return x, t, w

    k0, k1, k2, k3, k4 = jax.random.split(key, 5)

    # 1) module's nominal small NCHW shape, kernel path forced (lane-dense slab).
    shape = (2, 4, 16, 16)
    x, t, w = make(shape, k0)
    out = jax.block_until_ready(weighted_mse_loss(x, t, w, min_kernel_elems=0))
    ref = (x - t) ** 2 * w
    assert out.shape == shape and out.dtype == x.dtype
    assert jnp.allclose(out, ref, atol=1e-6, rtol=1e-6), "mismatch (1: aligned)"

    # 2) flat size not a multiple of 128 -> single-pass (1, n) ragged-lane path.
    shape2 = (2, 3, 17, 13)
    x2, t2, w2 = make(shape2, k1)
    out2 = jax.block_until_ready(weighted_mse_loss(x2, t2, w2, min_kernel_elems=0))
    ref2 = (x2 - t2) ** 2 * w2
    assert jnp.allclose(out2, ref2, atol=1e-6, rtol=1e-6), "mismatch (2: ragged lanes)"

    # 3) multi-block grid via explicit tile override (rows=2048, tr=512 -> grid=4).
    shape3 = (2, 8, 128, 128)
    x3, t3, w3 = make(shape3, k2)
    out3 = jax.block_until_ready(
        weighted_mse_loss(x3, t3, w3, tile_rows=512, min_kernel_elems=0))
    ref3 = (x3 - t3) ** 2 * w3
    assert jnp.allclose(out3, ref3, atol=1e-6, rtol=1e-6), "mismatch (3: multi-block)"

    # 4) 128-aligned size whose row count does not divide the tile ->
    #    ragged (masked) last sublane block on the main path.
    shape4 = (2, 5, 129, 128)
    x4, t4, w4 = make(shape4, k3)
    out4 = jax.block_until_ready(weighted_mse_loss(x4, t4, w4, min_kernel_elems=0))
    ref4 = (x4 - t4) ** 2 * w4
    assert jnp.allclose(out4, ref4, atol=1e-6, rtol=1e-6), "mismatch (4: ragged rows)"

    # 5) bf16 inputs: packing-aware tile, native bf16 compute on v6e/v7x.
    shape5 = (2, 8, 16, 16)
    x5, t5, w5 = make(shape5, k4, dtype=jnp.bfloat16)
    out5 = jax.block_until_ready(weighted_mse_loss(x5, t5, w5, min_kernel_elems=0))
    ref5 = ((x5.astype(jnp.float32) - t5.astype(jnp.float32)) ** 2
            * w5.astype(jnp.float32))
    assert out5.dtype == jnp.bfloat16
    assert jnp.allclose(out5.astype(jnp.float32), ref5, rtol=5e-2, atol=1e-3), \
        "mismatch (5: bf16)"

    # 6) default path: tiny input takes the plain fused-XLA fallback.
    out6 = jax.block_until_ready(weighted_mse_loss(x, t, w))
    assert jnp.allclose(out6, ref, atol=1e-6, rtol=1e-6), "mismatch (6: fallback)"

    print("KERNEL_OK")
</pallas_src>

<mosaic_0001>
module attributes {stable_mosaic.version = 11 : i64} {
  func.func @_wmse_kernel(%arg0: i32, %arg1: memref<16x128xf32, #tpu.memory_space<vmem>>, %arg2: memref<16x128xf32, #tpu.memory_space<vmem>>, %arg3: memref<16x128xf32, #tpu.memory_space<vmem>>, %arg4: memref<16x128xf32, #tpu.memory_space<vmem>>) attributes {dimension_semantics = [#tpu.dimension_semantics<parallel>], iteration_bounds = array<i64: 1>, scalar_prefetch = 0 : i64, scratch_operands = 0 : i64, tpu.core_type = #tpu.core_type<tc>, window_params = [{transform_indices = @transform_0, window_bounds = array<i64: 16, 128>}, {transform_indices = @transform_1, window_bounds = array<i64: 16, 128>}, {transform_indices = @transform_2, window_bounds = array<i64: 16, 128>}, {transform_indices = @transform_3, window_bounds = array<i64: 16, 128>}]} {
    %c0 = arith.constant 0 : index
    %c0_0 = arith.constant 0 : index
    %0 = vector.load %arg1[%c0, %c0_0] : memref<16x128xf32, #tpu.memory_space<vmem>>, vector<16x128xf32>
    %c0_1 = arith.constant 0 : index
    %c0_2 = arith.constant 0 : index
    %1 = vector.load %arg2[%c0_1, %c0_2] : memref<16x128xf32, #tpu.memory_space<vmem>>, vector<16x128xf32>
    %c0_3 = arith.constant 0 : index
    %c0_4 = arith.constant 0 : index
    %2 = vector.load %arg3[%c0_3, %c0_4] : memref<16x128xf32, #tpu.memory_space<vmem>>, vector<16x128xf32>
    %3 = arith.subf %0, %1 : vector<16x128xf32>
    %4 = arith.mulf %3, %3 : vector<16x128xf32>
    %5 = arith.mulf %4, %2 : vector<16x128xf32>
    %c0_5 = arith.constant 0 : index
    %c0_6 = arith.constant 0 : index
    %6 = vector.load %arg4[%c0_5, %c0_6] : memref<16x128xf32, #tpu.memory_space<vmem>>, vector<16x128xf32>
    tpu.vector_store %arg4[%c0_5, %c0_6], %5 {strides = array<i32>} : memref<16x128xf32, #tpu.memory_space<vmem>>, vector<16x128xf32>,
    return
  }
  func.func @transform_0(%arg0: i32) -> (i32, i32) {
    %c0_i32 = arith.constant 0 : i32
    %c0_i32_0 = arith.constant 0 : i32
    return %arg0, %c0_i32 : i32, i32
  }
  func.func @transform_1(%arg0: i32) -> (i32, i32) {
    %c0_i32 = arith.constant 0 : i32
    %c0_i32_0 = arith.constant 0 : i32
    return %arg0, %c0_i32 : i32, i32
  }
  func.func @transform_2(%arg0: i32) -> (i32, i32) {
    %c0_i32 = arith.constant 0 : i32
    %c0_i32_0 = arith.constant 0 : i32
    return %arg0, %c0_i32 : i32, i32
  }
  func.func @transform_3(%arg0: i32) -> (i32, i32) {
    %c0_i32 = arith.constant 0 : i32
    %c0_i32_0 = arith.constant 0 : i32
    return %arg0, %c0_i32 : i32, i32
  }
}

</mosaic_0001>

<bundles_post_ra>
// kernel: tpu_custom_call.1
= control target key start
LH: loop header
LB: loop body
LE: loop exit
PB: predicated region body
PF: predicated region fallthrough
CT: control target
= control target key end

     0   :  { %8 = vsyncpa [#allocation3], 0  ;;  %s230_s0 = inlined_call_operand.hbm [shape: f32[16,128], index: 0, kind: input, shape index: {}]   ;;  %s231_s1 = inlined_call_operand.hbm [shape: f32[16,128], index: 1, kind: input, shape index: {}]   ;;  %s232_s2 = inlined_call_operand.hbm [shape: f32[16,128], index: 2, kind: input, shape index: {}]   ;;  %s233_s3 = inlined_call_operand.hbm [shape: f32[16,128], index: 3, kind: output, shape index: {}]  }
   0x1   :  { %9 = vsyncpa [#allocation6], 0 }
   0x2   :  { %10 = vsyncpa [#allocation4], 0  ;;  %s180_s12 = smov [#allocation5]   ;;  %s181_s14 = smov [#allocation2]  }
   0x3   :  { %s28_s13 = sshll.u32 %s180_s12, 4  ;;  %s16_s15 = sshll.u32 %s181_s14, 4  ;;  %s29_s13 = int_to_ptr.vmem [resolvable:$true] %s28_s13  ;;  %s17_s15 = int_to_ptr.vmem [resolvable:$true] %s16_s15 }
   0x4   :  { %s102_s16 = scalar_lea.vmem %s29_s13, 256  ;;  %p107_p1 = scmp.lt.s32.totalorder %s29_s13, %s29_s13 }
   0x5   :  { %p103_p0 = scmp.ne.s32.totalorder %s29_s13, %s102_s16  ;;  %p108_p2 = scmp.lt.s32.totalorder %s102_s16, %s102_s16 }
   0x7   :  { %p109_p3 = por %p108_p2, %p107_p1 }
   0x9   :  { %p110_p4 = pnand %p109_p3, %p103_p0 }
   0xb   :  { %113 = shalt.err (!%p110_p4)
}
   0xc   :  { %s182_s17 = smov 128   ;;  %s183_s18 = smov 8  }
   0xd   :  { %34 = dma.hbm_to_vmem [thread:$0]  %s231_s1, 256, %s29_s13, [#allocation6], %s182_s17, %s182_s17, %s183_s18  }
   0xe   :  { %s122_s21 = scalar_lea.vmem %s17_s15, 256  ;;  %p127_p6 = scmp.lt.s32.totalorder %s17_s15, %s17_s15 }
   0xf   :  { %p123_p5 = scmp.ne.s32.totalorder %s17_s15, %s122_s21  ;;  %p128_p7 = scmp.lt.s32.totalorder %s122_s21, %s122_s21 }
  0x11   :  { %p129_p8 = por %p128_p7, %p127_p6 }
  0x13   :  { %p130_p9 = pnand %p129_p8, %p123_p5 }
  0x15   :  { %133 = shalt.err (!%p130_p9)
}
  0x16   :  { %22 = dma.hbm_to_vmem [thread:$0]  %s230_s0, 256, %s17_s15, [#allocation3], %s182_s17, %s182_s17, %s183_s18  }
  0x17   :  { %s184_s24 = smov [#allocation7]  }
  0x18   :  { %s40_s25 = sshll.u32 %s184_s24, 4  ;;  %s41_s25 = int_to_ptr.vmem [resolvable:$true] %s40_s25 }
  0x19   :  { %s142_s26 = scalar_lea.vmem %s41_s25, 256  ;;  %p147_p11 = scmp.lt.s32.totalorder %s41_s25, %s41_s25 }
  0x1a   :  { %p143_p10 = scmp.ne.s32.totalorder %s41_s25, %s142_s26  ;;  %p148_p12 = scmp.lt.s32.totalorder %s142_s26, %s142_s26 }
  0x1c   :  { %p149_p13 = por %p148_p12, %p147_p11 }
  0x1e   :  { %p150_p0 = pnand %p149_p13, %p143_p10 }
  0x20   :  { %153 = shalt.err (!%p150_p0)
}
  0x21   :  { %46 = dma.hbm_to_vmem [thread:$0]  %s232_s2, 256, %s41_s25, [#allocation6], %s182_s17, %s182_s17, %s183_s18  }
  0x22   :  { %174 = dma.done.wait [#allocation3], 256  }
  0x23   :  { %175 = vsyncadd [#allocation3], 4294967040 }
  0x24   :  { %176 = dma.done.wait [#allocation6], 512  }
  0x25   :  { %177 = vsyncadd [#allocation6], 4294966784  ;;  %v56_v0 = vld [vmem:[#allocation2] sm:$0xff]  ;;  %v58_v1 = vld [vmem:[#allocation5] sm:$0xff]  ;;  %s185_s0 = smov [#allocation8]  }
  0x26   :  { %v62_v2 = vsub.f32 %v56_v0, %v58_v1  ;;  %v57_v3 = vld [vmem:[#allocation2 + $0x8] sm:$0xff]  ;;  %v59_v4 = vld [vmem:[#allocation5 + $0x8] sm:$0xff]  ;;  %v60_v5 = vld [vmem:[#allocation7] sm:$0xff]  ;;  %s75_s28 = sshll.u32 %s185_s0, 4  ;;  %s76_s28 = int_to_ptr.vmem [resolvable:$true] %s75_s28 }
  0x27   :  { %v63_v6 = vsub.f32 %v57_v3, %v59_v4  ;;  %v61_v8 = vld [vmem:[#allocation7 + $0x8] sm:$0xff]  ;;  %s154_s2 = scalar_lea.vmem %s76_s28, 256  ;;  %p159_p2 = scmp.lt.s32.totalorder %s76_s28, %s76_s28 }
  0x28   :  { %v64_v7 = vmul.f32 %v62_v2, %v62_v2  ;;  %p155_p1 = scmp.ne.s32.totalorder %s76_s28, %s154_s2  ;;  %p160_p3 = scmp.lt.s32.totalorder %s154_s2, %s154_s2 }
  0x29   :  { %v65_v9 = vmul.f32 %v63_v6, %v63_v6 }
  0x2a   :  { %v66_v10 = vmul.f32 %v64_v7, %v60_v5  ;;  %p161_p4 = por %p160_p3, %p159_p2 }
  0x2b   :  { %v67_v11 = vmul.f32 %v65_v9, %v61_v8 }
  0x2c   :  { %68 = vst [vmem:[#allocation8] sm:$0xff] %v66_v10  ;;  %p162_p5 = pnand %p161_p4, %p155_p1 }
  0x2d   :  { %69 = vst [vmem:[#allocation8 + $0x8] sm:$0xff] %v67_v11 }
  0x2e   :  { %165 = shalt.err (!%p162_p5)
}
  0x2f   :  { %81 = dma.vmem_to_hbm [thread:$0]  %s76_s28, 256, %s233_s3, [#allocation4], %s182_s17, %s182_s17, %s183_s18  }
  0x30   :  { %178 = dma.done.wait [#allocation4], 256  }
  0x31   :  { %179 = vsyncadd [#allocation4], 4294967040 }
  0x32   :  { %85 = vsyncpa [#allocation3], 1 }
  0x33   :  { %86 = vsyncpa [#allocation6], 1 }
  0x34   :  { %87 = vsyncpa [#allocation4], 1 }

</bundles_post_ra>
